<compile_context>
chip_gen: v7x
topology: tpu7x:2x2x1
jax: 0.10.0
libtpu: 0.0.40
codegen_flags: <defaults>
</compile_context>

<pallas_src>
import jax
import jax.numpy as jnp
from jax.experimental import pallas as pl
from jax.experimental.pallas import tpu as pltpu

_LANES = 128
_TARGET_BLOCK_BYTES = 8 * 1024 * 1024    # ~8 MiB blocks (f32-equivalent footprint)
_VMEM_LIMIT_BYTES = 40 * 1024 * 1024     # 2 arrays x 2 bufs x 8 MiB + headroom (< 64 MiB v7x/TC)
_MIN_PALLAS_ELEMENTS = 64 * 1024         # below this, fused jnp beats a kernel launch


def _relu1_kernel(x_ref, o_ref):
    # relu6(x)/6 == clip(x, 0, 6) * (1/6); compute in f32 (VPU work is free, op is
    # HBM-bound) and cast once on the way out.
    x = x_ref[...].astype(jnp.float32)
    y = jnp.minimum(jnp.maximum(x, 0.0), 6.0) * (1.0 / 6.0)
    o_ref[...] = y.astype(o_ref.dtype)


def _relu1_jnp(x):
    y = jnp.minimum(jnp.maximum(x.astype(jnp.float32), 0.0), 6.0) * (1.0 / 6.0)
    return y.astype(x.dtype)


def _block_rows_for(rows: int, row_bytes: int, row_align: int) -> int:
    """Row-block size: ~_TARGET_BLOCK_BYTES, multiple of row_align (or full rows),
    and capped at ~rows/2 when rows allow so the grid has >= 2 steps (v7x megacore)."""
    br = max(row_align, (_TARGET_BLOCK_BYTES // row_bytes) // row_align * row_align)
    if rows >= 2 * row_align:
        br = min(br, max(row_align, (rows // 2) // row_align * row_align))
    return min(br, rows)


def relu1(x: jax.Array, *, min_pallas_elements: int = _MIN_PALLAS_ELEMENTS) -> jax.Array:
    """Elementwise relu6(x)/6 (PyTorch Relu1.forward) via a Pallas TPU kernel."""
    if not jnp.issubdtype(x.dtype, jnp.floating):
        raise TypeError(f"relu1 expects a floating dtype, got {x.dtype}")

    orig_shape = x.shape
    n = x.size
    if n == 0:
        return x
    if n < max(min_pallas_elements, 1):
        # Tiny activations: let XLA fuse this with the producer instead of paying
        # standalone kernel-launch / DMA-setup overhead.
        return _relu1_jnp(x)

    itemsize = jnp.dtype(x.dtype).itemsize
    eff_itemsize = max(itemsize, 4)  # budget blocks as if f32 (in-kernel widening)
    cost = pl.CostEstimate(flops=3 * n, transcendentals=0,
                           bytes_accessed=2 * n * itemsize)

    if n % _LANES == 0:
        # Lane-dense path: widest W with unmasked full-width stores and >= 8 sublanes.
        candidates = (4096, 2048, 1024, 512, 256, 128)
        W = next((w for w in candidates if n % w == 0 and n // w >= 8),
                 next(w for w in candidates if n % w == 0))
        rows = n // W
        block_rows = _block_rows_for(rows, W * eff_itemsize, 32)
    else:
        # Ragged element count: single pass over a (leading, last-dim) view. The lane
        # dim equals the full array dim, so Pallas masks the partial lanes -- no
        # concatenate / second pass over the output.
        W = orig_shape[-1] if x.ndim >= 2 else n
        rows = n // W
        row_bytes = pl.cdiv(W, _LANES) * _LANES * eff_itemsize  # VMEM rows are lane-padded
        if row_bytes * min(rows, 8) > _TARGET_BLOCK_BYTES:
            # TODO(synk): pathological ragged layout (huge non-128-multiple last dim);
            # fall back to fused jnp rather than an undersized / overflowing kernel.
            return _relu1_jnp(x)
        block_rows = _block_rows_for(rows, row_bytes, 8)

    x2d = x.reshape(rows, W)  # bitcast for contiguous (default-layout) inputs
    grid = (pl.cdiv(rows, block_rows),)

    out2d = pl.pallas_call(
        _relu1_kernel,
        out_shape=jax.ShapeDtypeStruct((rows, W), x.dtype),
        grid_spec=pltpu.PrefetchScalarGridSpec(
            num_scalar_prefetch=0,
            grid=grid,
            in_specs=[pl.BlockSpec((block_rows, W), lambda i: (i, 0))],
            out_specs=pl.BlockSpec((block_rows, W), lambda i: (i, 0)),
        ),
        compiler_params=pltpu.CompilerParams(
            dimension_semantics=("parallel",),   # shards grid steps across TCs on v7x
            vmem_limit_bytes=_VMEM_LIMIT_BYTES,
        ),
        cost_estimate=cost,
    )(x2d)

    return out2d.reshape(orig_shape)


def relu1_reference(x: jax.Array) -> jax.Array:
    return jnp.clip(x, 0.0, 6.0) / 6.0


if __name__ == "__main__":
    key = jax.random.PRNGKey(0)
    # NCHW activation consistent with a conv-style DepthHead feature map.
    x = jax.random.normal(key, (2, 4, 16, 16), dtype=jnp.float32) * 4.0
    y_ref = relu1_reference(x)

    # 1) Pallas lane-dense path on the demo shape (force past the tiny-tensor fallback).
    y = jax.block_until_ready(relu1(x, min_pallas_elements=0))
    assert y.shape == x.shape and y.dtype == x.dtype
    assert jnp.allclose(y, y_ref, atol=1e-6, rtol=1e-6)

    # 2) Default path for tiny tensors (fused jnp) must agree.
    y_small = jax.block_until_ready(relu1(x))
    assert jnp.allclose(y_small, y_ref, atol=1e-6, rtol=1e-6)

    # 3) Ragged element count (n % 128 != 0): single Pallas pass, no concatenate.
    x_r = jax.random.normal(jax.random.PRNGKey(0), (2, 3, 16, 17), dtype=jnp.float32) * 4.0
    y_r = jax.block_until_ready(relu1(x_r, min_pallas_elements=0))
    assert y_r.shape == x_r.shape and y_r.dtype == x_r.dtype
    assert jnp.allclose(y_r, relu1_reference(x_r), atol=1e-6, rtol=1e-6)

    print("KERNEL_OK")
</pallas_src>

<mosaic_0001>
module attributes {stable_mosaic.version = 11 : i64} {
  func.func @_relu1_kernel(%arg0: i32, %arg1: memref<8x256xf32, #tpu.memory_space<vmem>>, %arg2: memref<8x256xf32, #tpu.memory_space<vmem>>) attributes {dimension_semantics = [#tpu.dimension_semantics<parallel>], iteration_bounds = array<i64: 1>, scalar_prefetch = 0 : i64, scratch_operands = 0 : i64, tpu.core_type = #tpu.core_type<tc>, window_params = [{transform_indices = @transform_0, window_bounds = array<i64: 8, 256>}, {transform_indices = @transform_1, window_bounds = array<i64: 8, 256>}]} {
    %c0 = arith.constant 0 : index
    %c0_0 = arith.constant 0 : index
    %0 = vector.load %arg1[%c0, %c0_0] : memref<8x256xf32, #tpu.memory_space<vmem>>, vector<8x256xf32>
    %cst = arith.constant 0.000000e+00 : f32
    %1 = vector.broadcast %cst : f32 to vector<8x256xf32>
    %2 = arith.maximumf %0, %1 : vector<8x256xf32>
    %cst_1 = arith.constant 6.000000e+00 : f32
    %3 = vector.broadcast %cst_1 : f32 to vector<8x256xf32>
    %4 = arith.minimumf %2, %3 : vector<8x256xf32>
    %cst_2 = arith.constant 0.166666672 : f32
    %5 = vector.broadcast %cst_2 : f32 to vector<8x256xf32>
    %6 = arith.mulf %4, %5 : vector<8x256xf32>
    %c0_3 = arith.constant 0 : index
    %c0_4 = arith.constant 0 : index
    %7 = vector.load %arg2[%c0_3, %c0_4] : memref<8x256xf32, #tpu.memory_space<vmem>>, vector<8x256xf32>
    tpu.vector_store %arg2[%c0_3, %c0_4], %6 {strides = array<i32>} : memref<8x256xf32, #tpu.memory_space<vmem>>, vector<8x256xf32>,
    return
  }
  func.func @transform_0(%arg0: i32) -> (i32, i32) {
    %c0_i32 = arith.constant 0 : i32
    %c0_i32_0 = arith.constant 0 : i32
    return %arg0, %c0_i32 : i32, i32
  }
  func.func @transform_1(%arg0: i32) -> (i32, i32) {
    %c0_i32 = arith.constant 0 : i32
    %c0_i32_0 = arith.constant 0 : i32
    return %arg0, %c0_i32 : i32, i32
  }
}

</mosaic_0001>

<bundles_post_ra>
// kernel: tpu_custom_call.1
= control target key start
LH: loop header
LB: loop body
LE: loop exit
PB: predicated region body
PF: predicated region fallthrough
CT: control target
= control target key end

     0   :  { %6 = vsyncpa [#allocation3], 0  ;;  %s132_s0 = inlined_call_operand.hbm [shape: f32[8,256], index: 0, kind: input, shape index: {}]   ;;  %s133_s1 = inlined_call_operand.hbm [shape: f32[8,256], index: 1, kind: output, shape index: {}]  }
   0x1   :  { %7 = vsyncpa [#allocation4], 0  ;;  %s96_s6 = smov [#allocation2]   ;;  %s48_s10 = scalar_lea.hbm %s132_s0, 256 }
   0x2   :  { %s14_s7 = sshll.u32 %s96_s6, 4  ;;  %p49_p0 = scmp.ne.s32.totalorder %s132_s0, %s48_s10  ;;  %s15_s7 = int_to_ptr.vmem [resolvable:$true] %s14_s7 }
   0x3   :  { %p52_p1 = scmp.lt.u32.totalorder %s48_s10, %s132_s0 }
   0x5   :  { %p54_p2 = pnand %p52_p1, %p49_p0 }
   0x7   :  { %57 = shalt.err (!%p54_p2)
}
   0x8   :  { %s58_s15 = scalar_lea.vmem %s15_s7, 256  ;;  %p63_p4 = scmp.lt.s32.totalorder %s15_s7, %s15_s7 }
   0x9   :  { %p59_p3 = scmp.ne.s32.totalorder %s15_s7, %s58_s15  ;;  %p64_p5 = scmp.lt.s32.totalorder %s58_s15, %s58_s15 }
   0xb   :  { %p65_p6 = por %p64_p5, %p63_p4 }
   0xd   :  { %p66_p7 = pnand %p65_p6, %p59_p3 }
   0xf   :  { %69 = shalt.err (!%p66_p7)
}
  0x10   :  { %17 = dma.hbm_to_vmem [thread:$0]  %s132_s0, 256, %s15_s7, [#allocation3]  }
  0x11   :  { %92 = dma.done.wait [#allocation3], 256  }
  0x12   :  { %93 = vsyncadd [#allocation3], 4294967040  ;;  %v21_v0 = vld [vmem:[#allocation2] sm:$0xff]  ;;  %v22_v1 = vld [vmem:[#allocation2 + $0x8] sm:$0xff]  ;;  %s97_s18 = smov [#allocation5]  }
  0x13   :  { %v23_v2 = vmax.f32 %v21_v0, 0.0  ;;  %v24_v3 = vmax.f32 %v22_v1, 0.0  ;;  %s37_s19 = sshll.u32 %s97_s18, 4  ;;  %s38_s19 = int_to_ptr.vmem [resolvable:$true] %s37_s19 }
  0x14   :  { %s70_s20 = scalar_lea.vmem %s38_s19, 256  ;;  %p75_p9 = scmp.lt.s32.totalorder %s38_s19, %s38_s19 }
  0x15   :  { %v25_v4 = vmin.f32 %v23_v2, 6.0  ;;  %v26_v5 = vmin.f32 %v24_v3, 6.0  ;;  %p71_p8 = scmp.ne.s32.totalorder %s38_s19, %s70_s20  ;;  %p76_p10 = scmp.lt.s32.totalorder %s70_s20, %s70_s20 }
  0x17   :  { %v27_v6 = vmul.f32 0.16666667, %v25_v4  ;;  %v28_v7 = vmul.f32 0.16666667, %v26_v5  ;;  %p77_p11 = por %p76_p10, %p75_p9 }
  0x19   :  { %29 = vst [vmem:[#allocation5] sm:$0xff] %v27_v6  ;;  %30 = vst [vmem:[#allocation5 + $0x8] sm:$0xff] %v28_v7  ;;  %p78_p12 = pnand %p77_p11, %p71_p8 }
  0x1b   :  { %81 = shalt.err (!%p78_p12)
}
  0x1c   :  { %s82_s22 = scalar_lea.hbm %s133_s1, 256 }
  0x1d   :  { %p83_p13 = scmp.ne.s32.totalorder %s133_s1, %s82_s22  ;;  %p86_p0 = scmp.lt.u32.totalorder %s82_s22, %s133_s1 }
  0x1f   :  { %p88_p1 = pnand %p86_p0, %p83_p13 }
  0x21   :  { %91 = shalt.err (!%p88_p1)
}
  0x22   :  { %40 = dma.vmem_to_hbm [thread:$0]  %s38_s19, 256, %s133_s1, [#allocation4]  }
  0x23   :  { %94 = dma.done.wait [#allocation4], 256  }
  0x24   :  { %95 = vsyncadd [#allocation4], 4294967040 }
  0x25   :  { %44 = vsyncpa [#allocation3], 1 }
  0x26   :  { %45 = vsyncpa [#allocation4], 1 }

</bundles_post_ra>
